<compile_context>
chip_gen: v6e
topology: v6e:2x2x1
jax: 0.10.0
libtpu: 0.0.40
codegen_flags: <defaults>
</compile_context>

<pallas_src>
import jax
import jax.numpy as jnp
from jax import lax
from jax.experimental import pallas as pl
from jax.experimental.pallas import tpu as pltpu


def _round_up(a: int, b: int) -> int:
    return ((a + b - 1) // b) * b


def _vmem_capacity_bytes() -> int:
    try:
        return int(pltpu.get_tpu_info().vmem_capacity_bytes)
    except Exception:
        return 64 * 1024 * 1024  # conservative fallback (v7x-sized)


# ------------------------- kernels -------------------------

def _linear_small_kernel(x_ref, w_ref, b_ref, o_ref):
    # Whole arrays in VMEM: x (B, In), w (Out, In), b (1, Out), o (B, Out).
    # Tiny-shape case: keep the PyTorch (Out, In) layout and contract in-kernel.
    acc = lax.dot_general(
        x_ref[...], w_ref[...],
        dimension_numbers=(((1,), (1,)), ((), ())),
        preferred_element_type=jnp.float32,
    )
    o_ref[...] = (acc + b_ref[...]).astype(o_ref.dtype)


def _linear_tiled_kernel(x_ref, wt_ref, b_ref, o_ref):
    # x (tm, tk), wt (tk, tn), b (1, tn), o (tm, tn); o is resident across k.
    k = pl.program_id(2)

    @pl.when(k == 0)
    def _():
        # Initialize the resident output tile with the bias (added exactly once).
        o_ref[...] = jnp.broadcast_to(b_ref[...], o_ref.shape).astype(o_ref.dtype)

    # Accumulate MXU partial products directly into the f32 output tile.
    o_ref[...] += jnp.dot(
        x_ref[...], wt_ref[...], preferred_element_type=jnp.float32
    ).astype(o_ref.dtype)


# ------------------------- wrapper -------------------------

def linear_regression_forward(x, weight, bias, *, tm=None, tn=None, tk=None,
                              use_bf16_inputs=False, force_tiled=False):
    """y = x @ weight.T + bias, matching torch.nn.Linear.

    x:      (B, inputSize)          float32
    weight: (outputSize, inputSize) float32   (PyTorch layout)
    bias:   (outputSize,)           float32
    returns (B, outputSize)         float32
    """
    B, in_features = x.shape
    out_features, in_features_w = weight.shape
    assert in_features == in_features_w and bias.shape == (out_features,)

    bias2d = bias.reshape(1, out_features)

    # ---- Small-shape fast path: whole operands comfortably fit in VMEM. ----
    total_bytes = 4 * (B * in_features + out_features * in_features
                       + 2 * B * out_features + out_features)
    if not force_tiled and total_bytes <= 4 * 1024 * 1024:
        return pl.pallas_call(
            _linear_small_kernel,
            out_shape=jax.ShapeDtypeStruct((B, out_features), x.dtype),
        )(x, weight, bias2d)

    # ---- Tiled path ----
    vmem_cap = _vmem_capacity_bytes()

    b_pad = _round_up(B, 8)
    out_pad = _round_up(out_features, 128)   # lane-dense output
    in_pad = _round_up(in_features, 128)

    if vmem_cap >= 96 * 1024 * 1024:          # v5e / v6e class (128 MiB physical VMEM)
        tm_d, tn_d, tk_d = 1024, 1024, 2048
    else:                                     # v7x class (64 MiB) or unknown
        tm_d, tn_d, tk_d = 512, 1024, 1024

    tm = min(tm if tm is not None else tm_d, b_pad)
    tn = min(tn if tn is not None else tn_d, out_pad)
    tk = min(tk if tk is not None else tk_d, in_pad)
    assert tm % 8 == 0 and tn % 128 == 0 and tk % 128 == 0

    # Keep >= 2 parallel grid steps so both TensorCores on dual-TC parts get work.
    if (b_pad // tm) * (out_pad // tn) < 2:
        if tn % 256 == 0 and out_pad % (tn // 2) == 0:
            tn //= 2
        elif tm % 16 == 0 and b_pad % (tm // 2) == 0:
            tm //= 2

    b_pad = _round_up(b_pad, tm)
    out_pad = _round_up(out_pad, tn)
    in_pad = _round_up(in_pad, tk)

    in_dtype = jnp.bfloat16 if use_bf16_inputs else x.dtype
    x_p = jnp.pad(x, ((0, b_pad - B), (0, in_pad - in_features))).astype(in_dtype)
    # One-time transpose to (In, Out): plain (tm,tk)@(tk,tn) inside the kernel.
    wt_p = jnp.pad(weight.T, ((0, in_pad - in_features),
                              (0, out_pad - out_features))).astype(in_dtype)
    b_p = jnp.pad(bias2d, ((0, 0), (0, out_pad - out_features)))

    grid = (b_pad // tm, out_pad // tn, in_pad // tk)
    grid_i, grid_j, _ = grid

    bpe = jnp.dtype(in_dtype).itemsize
    tile_bytes = 2 * (tm * tk * bpe + tk * tn * bpe + tn * 4) + 2 * tm * tn * 4
    vmem_limit = max(32 * 1024 * 1024, int(tile_bytes * 1.5))
    vmem_limit = min(vmem_limit, max(vmem_cap - 16 * 1024 * 1024, 32 * 1024 * 1024))

    cost = pl.CostEstimate(
        flops=2 * b_pad * in_pad * out_pad,
        transcendentals=0,
        # x re-streamed grid_j times, weight re-streamed grid_i times.
        bytes_accessed=(bpe * b_pad * in_pad * grid_j
                        + bpe * in_pad * out_pad * grid_i
                        + 4 * b_pad * out_pad),
    )

    y_p = pl.pallas_call(
        _linear_tiled_kernel,
        out_shape=jax.ShapeDtypeStruct((b_pad, out_pad), jnp.float32),
        grid_spec=pltpu.PrefetchScalarGridSpec(
            num_scalar_prefetch=0,
            grid=grid,
            in_specs=[
                pl.BlockSpec((tm, tk), lambda i, j, k: (i, k)),   # x tile
                pl.BlockSpec((tk, tn), lambda i, j, k: (k, j)),   # W^T tile
                pl.BlockSpec((1, tn), lambda i, j, k: (0, j)),    # bias tile
            ],
            out_specs=pl.BlockSpec((tm, tn), lambda i, j, k: (i, j)),
        ),
        compiler_params=pltpu.CompilerParams(
            dimension_semantics=("parallel", "parallel", "arbitrary"),
            vmem_limit_bytes=vmem_limit,
        ),
        cost_estimate=cost,
    )(x_p, wt_p, b_p)

    return y_p[:B, :out_features].astype(x.dtype)


if __name__ == "__main__":
    # Shapes consistent with the module: inputSize=32, outputSize=16, batch=8.
    batch, input_size, output_size = 8, 32, 16

    key = jax.random.PRNGKey(0)
    kx, kw, kb = jax.random.split(key, 3)

    x = jax.random.normal(kx, (batch, input_size), dtype=jnp.float32)
    # Mimic nn.Linear's uniform(-1/sqrt(in), 1/sqrt(in)) init.
    bound = 1.0 / jnp.sqrt(jnp.float32(input_size))
    weight = jax.random.uniform(kw, (output_size, input_size),
                                minval=-bound, maxval=bound, dtype=jnp.float32)
    bias = jax.random.uniform(kb, (output_size,),
                              minval=-bound, maxval=bound, dtype=jnp.float32)

    # Fast path (no padding, single whole-array call).
    y = linear_regression_forward(x, weight, bias)
    jax.block_until_ready(y)
    y_ref = x @ weight.T + bias
    assert y.shape == (batch, output_size)
    assert jnp.allclose(y, y_ref, atol=1e-5, rtol=1e-5)

    # Also exercise the tiled accumulate-into-output path (multi-step k grid).
    B2, In2, Out2 = 128, 512, 192
    k2 = jax.random.PRNGKey(1)
    kx2, kw2, kb2 = jax.random.split(k2, 3)
    x2 = jax.random.normal(kx2, (B2, In2), dtype=jnp.float32)
    w2 = jax.random.normal(kw2, (Out2, In2), dtype=jnp.float32) * 0.05
    b2 = jax.random.normal(kb2, (Out2,), dtype=jnp.float32)
    y2 = linear_regression_forward(x2, w2, b2, tm=64, tn=128, tk=128,
                                   force_tiled=True)
    jax.block_until_ready(y2)
    y2_ref = x2 @ w2.T + b2
    assert jnp.allclose(y2, y2_ref, atol=1e-3, rtol=1e-3)

    print("KERNEL_OK")
</pallas_src>

<mosaic_0001>
module attributes {stable_mosaic.version = 11 : i64} {
  func.func @_linear_small_kernel(%arg0: memref<8x32xf32, #tpu.memory_space<vmem>>, %arg1: memref<16x32xf32, #tpu.memory_space<vmem>>, %arg2: memref<1x16xf32, #tpu.memory_space<vmem>>, %arg3: memref<8x16xf32, #tpu.memory_space<vmem>>) attributes {dimension_semantics = [], scalar_prefetch = 0 : i64, scratch_operands = 0 : i64, tpu.core_type = #tpu.core_type<tc>} {
    %c0 = arith.constant 0 : index
    %c0_0 = arith.constant 0 : index
    %0 = vector.load %arg0[%c0, %c0_0] : memref<8x32xf32, #tpu.memory_space<vmem>>, vector<8x32xf32>
    %c0_1 = arith.constant 0 : index
    %c0_2 = arith.constant 0 : index
    %1 = vector.load %arg1[%c0_1, %c0_2] : memref<16x32xf32, #tpu.memory_space<vmem>>, vector<16x32xf32>
    %cst = arith.constant dense<0.000000e+00> : vector<8x16xf32>
    %2 = tpu.matmul %0, %1, %cst {dimension_numbers = #tpu.dot_dimension_numbers<[1], [1], [0], [0], [0, 0, 1, 0], [], []>} : vector<8x32xf32>, vector<16x32xf32>, vector<8x16xf32> -> vector<8x16xf32>
    %c0_3 = arith.constant 0 : index
    %c0_4 = arith.constant 0 : index
    %3 = vector.load %arg2[%c0_3, %c0_4] : memref<1x16xf32, #tpu.memory_space<vmem>>, vector<1x16xf32>
    %4 = vector.broadcast %3 : vector<1x16xf32> to vector<8x16xf32>
    %5 = arith.addf %2, %4 : vector<8x16xf32>
    %c0_5 = arith.constant 0 : index
    %c0_6 = arith.constant 0 : index
    %6 = vector.load %arg3[%c0_5, %c0_6] : memref<8x16xf32, #tpu.memory_space<vmem>>, vector<8x16xf32>
    tpu.vector_store %arg3[%c0_5, %c0_6], %5 {strides = array<i32>} : memref<8x16xf32, #tpu.memory_space<vmem>>, vector<8x16xf32>,
    return
  }
}

</mosaic_0001>

<bundles_post_ra>
// kernel: tpu_custom_call.1
= control target key start
LH: loop header
LB: loop body
LE: loop exit
PB: predicated region body
PF: predicated region fallthrough
CT: control target
= control target key end

     0   :  { %8 = vsyncpa [#allocation3], 0  ;;  %s275_s0 = inlined_call_operand.hbm [shape: f32[8,32], index: 0, kind: input, shape index: {}]   ;;  %s276_s1 = inlined_call_operand.hbm [shape: f32[16,32], index: 1, kind: input, shape index: {}]   ;;  %s277_s2 = inlined_call_operand.vmem [shape: f32[1,16], index: 2, kind: input, shape index: {}]   ;;  %s278_s3 = inlined_call_operand.hbm [shape: f32[8,16], index: 3, kind: output, shape index: {}]  }
   0x1   :  { %9 = vsyncpa [#allocation6], 0 }
   0x2   :  { %10 = vsyncpa [#allocation4], 0  ;;  %s236_s12 = smov [#allocation2]   ;;  %s237_s14 = smov [#allocation5]  }
   0x3   :  { %s17_s13 = sshll.u32 %s236_s12, 4  ;;  %s26_s15 = sshll.u32 %s237_s14, 4  ;;  %s18_s13 = int_to_ptr.vmem [resolvable:$true] %s17_s13  ;;  %s27_s15 = int_to_ptr.vmem [resolvable:$true] %s26_s15 }
   0x4   :  { %s178_s16 = scalar_lea.vmem %s18_s13, 128  ;;  %p183_p1 = scmp.lt.s32.totalorder %s18_s13, %s18_s13 }
   0x5   :  { %p179_p0 = scmp.ne.s32.totalorder %s18_s13, %s178_s16  ;;  %p184_p2 = scmp.lt.s32.totalorder %s178_s16, %s178_s16 }
   0x7   :  { %p185_p3 = por %p184_p2, %p183_p1 }
   0x9   :  { %p186_p4 = pnand %p185_p3, %p179_p0 }
   0xb   :  { %189 = shalt.err (!%p186_p4)
}
   0xc   :  { %20 = dma.hbm_to_vmem [thread:$0]  %s275_s0, 128, %s18_s13, [#allocation3]  }
   0xd   :  { %s198_s19 = scalar_lea.vmem %s27_s15, 256  ;;  %p203_p6 = scmp.lt.s32.totalorder %s27_s15, %s27_s15 }
   0xe   :  { %p199_p5 = scmp.ne.s32.totalorder %s27_s15, %s198_s19  ;;  %p204_p7 = scmp.lt.s32.totalorder %s198_s19, %s198_s19 }
  0x10   :  { %p205_p8 = por %p204_p7, %p203_p6 }
  0x12   :  { %p206_p9 = pnand %p205_p8, %p199_p5 }
  0x14   :  { %209 = shalt.err (!%p206_p9)
}
  0x15   :  { %s238_s20 = smov 128   ;;  %s239_s21 = smov 8  }
  0x16   :  { %32 = dma.hbm_to_vmem [thread:$0]  %s276_s1, 256, %s27_s15, [#allocation6], %s238_s20, %s238_s20, %s239_s21  }
  0x17   :  { %230 = dma.done.wait [#allocation3], 128  }
  0x18   :  { %231 = vsyncadd [#allocation3], 4294967168 }
  0x19   :  { %232 = dma.done.wait [#allocation6], 256  }
  0x1a   :  { %233 = vsyncadd [#allocation6], 4294967040  ;;  %v240_v0 = vmov 0.0   ;;  %vm241_vm0 = vmmov 0   ;;  %vm51_vm1 = vcmask 261120   ;;  %v43_v1 = vld [vmem:[#allocation5 + $0x8] sm:$0xff] }
  0x1b   :  { %156 = vmatprep.subr.mxu0 %v240_v0  ;;  %160 = vmatprep.mubr.msk.f32.mxu0 %vm241_vm0, %v240_v0  ;;  %v42_v2 = vld [vmem:[#allocation5] sm:$0xff]  ;;  %v41_v3 = vld [vmem:[#allocation2] sm:$0xff]  ;;  %s242_s1 = smov [#allocation7]   ;;  %vm131_vm2 = vcmask 130048  }
  0x1c   :  { %157 = vmatpush3.xpose.msk.msra.mxu0 %vm51_vm1, %v43_v1  ;;  %v149_v4 = vld [vmem:[%s277_s2] ss:$0 sm:$0xff]  ;;  %s139_s25 = sshll.u32 %s242_s1, 4  ;;  %s140_s25 = int_to_ptr.vmem [resolvable:$true] %s139_s25 }
  0x1d   :  { %158 = vmatprep.subr.mxu0 %v240_v0  ;;  %s210_s26 = scalar_lea.vmem %s140_s25, 128  ;;  %p215_p11 = scmp.lt.s32.totalorder %s140_s25, %s140_s25 }
  0x1e   :  { %p211_p10 = scmp.ne.s32.totalorder %s140_s25, %s210_s26  ;;  %p216_p12 = scmp.lt.s32.totalorder %s210_s26, %s210_s26 }
  0x20   :  { %159 = vmatpush3.xpose.msk.msra.mxu0 %vm51_vm1, %v42_v2  ;;  %p217_p13 = por %p216_p12, %p215_p11 }
  0x22   :  { %p218_p0 = pnand %p217_p13, %p211_p10 }
  0x23   :  { %161 = vmatmul.mubr.msk.f32.vlgmr.msra.gmra.mxu0 %vm51_vm1, %v41_v3 }
  0xe3   :  { %v127_v5 = vpop.f32.mrf.mxu0 }
  0xe4   :  { %v128_v6 = vadd.f32 %v149_v4, %v127_v5 }
  0xe5   :  { %v162_v7 = vpop.f32.mrf.mxu0 }
  0xe6   :  { %132 = vst.msk [vmem:[#allocation7] sm:$0xff] %vm131_vm2, %v128_v6 }
  0xe7   :  { %221 = shalt.err (!%p218_p0)
}
  0xe8   :  { %142 = dma.vmem_to_hbm [thread:$0]  %s140_s25, 128, %s278_s3, [#allocation4]  }
  0xe9   :  { %234 = dma.done.wait [#allocation4], 128  }
  0xea   :  { %235 = vsyncadd [#allocation4], 4294967168 }
  0xeb   :  { %146 = vsyncpa [#allocation3], 1 }
  0xec   :  { %147 = vsyncpa [#allocation6], 1 }
  0xed   :  { %148 = vsyncpa [#allocation4], 1 }

</bundles_post_ra>
